<compile_context>
chip_gen: v6e
topology: v6e:2x2x1
jax: 0.10.0
libtpu: 0.0.40
codegen_flags: <defaults>
</compile_context>

<pallas_src>
import functools

import jax
import jax.numpy as jnp
from jax import lax
from jax.experimental import pallas as pl
from jax.experimental.pallas import tpu as pltpu


def _round_up(x, m):
    return ((x + m - 1) // m) * m


def _fold_partial(x):
    """(tile_h, W_pad) f32 -> (8, 128) partial sums using only whole-vreg VPU adds.

    tile_h is always a multiple of 8 and W_pad a multiple of 128 (wrapper guarantees),
    so every slice below is a full aligned vreg group and every add is lane-dense.
    """
    th, w = x.shape
    acc = x[0:8, :]
    for i in range(1, th // 8):
        acc = acc + x[i * 8:(i + 1) * 8, :]          # sublane-group adds
    out = acc[:, 0:128]
    for j in range(1, w // 128):
        out = out + acc[:, j * 128:(j + 1) * 128]    # lane-group adds
    return out


def _ce_kernel(y_ref, wh_ref, tgt_ref, parts_ref, *, C, W_pad, CB, ignore_index):
    """One grid step = (batch element n, H-tile t).  Emits per-step partial sums."""
    wh = wh_ref[...]                               # (tile_h, Hp)   matmul dtype
    tgt = tgt_ref[0].astype(jnp.int32)             # (tile_h, W_pad)

    n_blk = (C + CB - 1) // CB

    def up_block(b):
        """H-interp for CB channels at once: (tile_h, Hp) @ (Hp, cb*W_pad) -> f32."""
        c0 = b * CB
        cb = min(CB, C - c0)
        y_blk = y_ref[0, :, c0 * W_pad:(c0 + cb) * W_pad]      # aligned free lane view
        up = jnp.dot(wh, y_blk, preferred_element_type=jnp.float32)
        return c0, cb, up                                       # (tile_h, cb*W_pad) f32

    # ---- Pass 1: running max over channels (two-pass LSE: no online rescale). ----
    # Note: for very large class counts (C >~ 64) these unrolled Python loops should be
    # converted to lax.fori_loop over channel blocks; for parsing-sized C they give the
    # LLO scheduler full visibility.
    m = jnp.full(tgt.shape, -jnp.inf, dtype=jnp.float32)
    for b in range(n_blk):
        _, cb, up = up_block(b)
        for j in range(cb):
            m = jnp.maximum(m, up[:, j * W_pad:(j + 1) * W_pad])

    # ---- Pass 2: exp-sum + picked target logit. ----
    # The tiny (K = Hp) matmul is recomputed: the MXU is nearly idle in this kernel and
    # VMEM is the scarce resource, so recompute beats caching a (tile_h, C*W_pad) slab.
    ssum = jnp.zeros(tgt.shape, dtype=jnp.float32)
    picked = jnp.zeros(tgt.shape, dtype=jnp.float32)
    for b in range(n_blk):
        c0, cb, up = up_block(b)
        for j in range(cb):
            u = up[:, j * W_pad:(j + 1) * W_pad]
            ssum = ssum + jnp.exp(u - m)
            picked = picked + jnp.where(tgt == (c0 + j), u, 0.0)

    lse = m + jnp.log(ssum)
    valid = tgt != ignore_index
    per_pix = jnp.where(valid, lse - picked, 0.0)

    # Lane-dense per-step partial sums (rows 0-7: loss, rows 8-15: valid count).
    parts_ref[0, 0, 0:8, :] = _fold_partial(per_pix)
    parts_ref[0, 0, 8:16, :] = _fold_partial(valid.astype(jnp.float32))


def _interp_matrix(out_size, in_size):
    """(out_size, in_size) bilinear weight matrix, align_corners=True (float32)."""
    if out_size == 1:
        coords = jnp.zeros((1,), jnp.float32)
    else:
        coords = jnp.arange(out_size, dtype=jnp.float32) * (in_size - 1) / (out_size - 1)
    lo = jnp.clip(jnp.floor(coords).astype(jnp.int32), 0, in_size - 1)
    hi = jnp.clip(lo + 1, 0, in_size - 1)
    frac = coords - lo.astype(jnp.float32)
    rows = jnp.arange(out_size)
    w = jnp.zeros((out_size, in_size), jnp.float32)
    w = w.at[rows, lo].add(1.0 - frac)
    w = w.at[rows, hi].add(frac)
    return w


def _vmem_limit_bytes():
    """Generation-aware scoped-VMEM limit: ~3/4 of physical capacity, safe fallback."""
    try:
        info = pltpu.get_tpu_info()
        cap = getattr(info, "vmem_capacity_bytes", None)
        if cap:
            return int(cap) * 3 // 4     # ~96 MiB on v5e/v6e (128 MiB), ~48 MiB on v7x (64 MiB)
    except Exception:
        pass
    return 48 * 1024 * 1024


def _choose_tiles(H, W_pad, C, Hp, mm_bytes, label_bytes, limit):
    """Pick (tile_h, CB) so the per-step live VMEM set fits under `limit` with headroom."""
    CB = min(C, 8)                                     # channels per H-interp matmul
    fixed = 2 * Hp * C * W_pad * mm_bytes              # W-interp activations block (x2 bufs)
    fixed += 2 * 16 * 128 * 4                          # output slab (x2 bufs)
    headroom = 4 * 1024 * 1024
    per_row = (2 * W_pad * label_bytes                 # label tile (x2 bufs)
               + 2 * Hp * mm_bytes                     # wh tile (x2 bufs)
               + (6 + CB) * W_pad * 4)                 # f32 working set (m/ssum/picked/... + up)
    budget = max(limit - fixed - headroom, 32 * per_row)
    tile_h = (budget // per_row // 32) * 32
    tile_h = int(max(32, min(512, tile_h)))
    tile_h = min(tile_h, _round_up(H, 32))             # don't over-pad tiny maps
    return tile_h, CB


def cross_entropy_upsampled(pred, target, ignore_index=255, matmul_dtype=jnp.bfloat16):
    """mean_{valid px} CE(bilinear_align_corners(pred -> target spatial), target)."""
    N, C, Hp, Wp = pred.shape
    _, H, W = target.shape

    W_pad = _round_up(W, 128)
    mm_bytes = jnp.dtype(matmul_dtype).itemsize
    use_u8 = (C <= 255) and (0 <= ignore_index <= 255)   # parsing labels fit uint8
    label_dtype = jnp.uint8 if use_u8 else jnp.int32
    limit = _vmem_limit_bytes()
    tile_h, CB = _choose_tiles(H, W_pad, C, Hp, mm_bytes,
                               jnp.dtype(label_dtype).itemsize, limit)
    H_pad = _round_up(H, tile_h)
    n_ht = H_pad // tile_h

    # ---- wrapper-side layout plumbing (plain XLA, cheap: pred is low-res) ----
    # W-direction bilinear interp, hoisted out of the kernel; result laid out
    # channel-along-lanes, each channel zero-padded to W_pad lanes.
    ww = _interp_matrix(W, Wp)                                        # (W, Wp) f32
    yw = jnp.einsum('nchq,wq->nchw', pred.astype(jnp.float32), ww)    # (N, C, Hp, W) f32
    yw = jnp.pad(yw, ((0, 0), (0, 0), (0, 0), (0, W_pad - W)))
    y = jnp.transpose(yw, (0, 2, 1, 3)).reshape(N, Hp, C * W_pad).astype(matmul_dtype)

    wh = _interp_matrix(H, Hp)                                        # (H, Hp) f32
    wh = jnp.pad(wh, ((0, H_pad - H), (0, 0))).astype(matmul_dtype)   # zero rows -> 0 logits

    # Padded pixels (rows >= H, lanes >= W) carry ignore_index -> contribute exactly 0.
    labels = target.astype(label_dtype)
    labels = jnp.pad(labels, ((0, 0), (0, H_pad - H), (0, W_pad - W)),
                     constant_values=ignore_index)

    kernel = functools.partial(_ce_kernel, C=C, W_pad=W_pad, CB=CB,
                               ignore_index=ignore_index)
    parts = pl.pallas_call(
        kernel,
        out_shape=jax.ShapeDtypeStruct((N, n_ht, 16, 128), jnp.float32),
        grid_spec=pltpu.PrefetchScalarGridSpec(
            num_scalar_prefetch=0,
            grid=(N, n_ht),
            in_specs=[
                pl.BlockSpec((1, Hp, C * W_pad), lambda n, t: (n, 0, 0)),  # W-interp acts
                pl.BlockSpec((tile_h, Hp), lambda n, t: (t, 0)),           # wh H-tile
                pl.BlockSpec((1, tile_h, W_pad), lambda n, t: (n, t, 0)),  # labels H-tile
            ],
            out_specs=pl.BlockSpec((1, 1, 16, 128), lambda n, t: (n, t, 0, 0)),
        ),
        compiler_params=pltpu.CompilerParams(
            # No cross-tile scratch dependence anymore -> both axes are safely parallel
            # (megacore on v6e, dual TensorCore on v7x even when N == 1).
            dimension_semantics=("parallel", "parallel"),
            vmem_limit_bytes=int(limit),
        ),
    )(y, wh, labels)

    loss_sum = parts[:, :, 0:8, :].sum()
    cnt = parts[:, :, 8:16, :].sum()
    # Matches torch CrossEntropyLoss: all-ignored targets yield NaN (0/0).
    # Semantic divergence (documented): labels in [C, 255) that are not ignore_index
    # contribute `lse` (picked stays 0) instead of raising like torch.
    return loss_sum / cnt


def criterion_all(preds, target, ignore_index=255, matmul_dtype=jnp.bfloat16):
    """JAX/Pallas equivalent of CriterionAll.forward(preds, target).

    The edge-loss branch is commented out in the original module and is skipped here.
    """
    labels = target[0]
    preds_parsing = preds[0]
    if not isinstance(preds_parsing, (list, tuple)):
        preds_parsing = [preds_parsing]
    loss = jnp.float32(0.0)
    for p in preds_parsing:
        loss = loss + cross_entropy_upsampled(p, labels, ignore_index, matmul_dtype)
    return loss


def _reference_loss(preds, target, ignore_index=255):
    """Pure-JAX f32 reference (torch semantics: bilinear align_corners + CE mean over valid)."""
    labels = target[0].astype(jnp.int32)
    preds_parsing = preds[0]
    if not isinstance(preds_parsing, (list, tuple)):
        preds_parsing = [preds_parsing]
    H, W = labels.shape[1], labels.shape[2]
    total = jnp.float32(0.0)
    for p in preds_parsing:
        p = p.astype(jnp.float32)
        wh = _interp_matrix(H, p.shape[2])
        ww = _interp_matrix(W, p.shape[3])
        up = jnp.einsum('hp,ncpq,wq->nchw', wh, p, ww)
        lse = jax.nn.logsumexp(up, axis=1)                      # (N, H, W)
        safe = jnp.clip(labels, 0, p.shape[1] - 1)
        picked = jnp.take_along_axis(up, safe[:, None], axis=1)[:, 0]
        valid = labels != ignore_index
        per = jnp.where(valid, lse - picked, 0.0)
        total = total + per.sum() / valid.astype(jnp.float32).sum()
    return total


if __name__ == "__main__":
    key = jax.random.PRNGKey(0)
    k1, k2, k3 = jax.random.split(key, 3)

    N, C, Hp, Wp = 2, 4, 8, 8      # low-res parsing logits (NCHW)
    H, W = 16, 16                  # target label-map resolution

    pred = jax.random.normal(k1, (N, C, Hp, Wp), dtype=jnp.float32)
    labels = jax.random.randint(k2, (N, H, W), 0, C, dtype=jnp.int32)
    ignore_mask = jax.random.uniform(k3, (N, H, W)) < 0.1
    labels = jnp.where(ignore_mask, jnp.int32(255), labels)

    preds = [pred]      # preds[0] = parsing prediction (single-tensor branch)
    target = [labels]   # target[0] = parsing labels

    ref = jax.block_until_ready(_reference_loss(preds, target, ignore_index=255))

    # Exact-precision path (f32 matmuls): tight check against the pure-JAX reference.
    loss_f32 = jax.block_until_ready(
        criterion_all(preds, target, ignore_index=255, matmul_dtype=jnp.float32))
    assert jnp.allclose(loss_f32, ref, rtol=1e-4, atol=1e-4), (loss_f32, ref)

    # Performance path (bf16 matmul operands, f32 accumulation): bf16-level tolerance.
    loss_bf16 = jax.block_until_ready(
        criterion_all(preds, target, ignore_index=255, matmul_dtype=jnp.bfloat16))
    assert jnp.allclose(loss_bf16, ref, rtol=2e-2, atol=2e-2), (loss_bf16, ref)

    print("KERNEL_OK")
</pallas_src>

<mosaic_0001>
module attributes {stable_mosaic.version = 11 : i64} {
  func.func @_ce_kernel(%arg0: i32, %arg1: i32, %arg2: memref<1x8x512xf32, #tpu.memory_space<vmem>>, %arg3: memref<32x8xf32, #tpu.memory_space<vmem>>, %arg4: memref<1x32x128xi8, #tpu.memory_space<vmem>>, %arg5: memref<1x1x16x128xf32, #tpu.memory_space<vmem>>) attributes {dimension_semantics = [#tpu.dimension_semantics<parallel>, #tpu.dimension_semantics<parallel>], iteration_bounds = array<i64: 2, 1>, scalar_prefetch = 0 : i64, scratch_operands = 0 : i64, tpu.core_type = #tpu.core_type<tc>, window_params = [{transform_indices = @transform_0, window_bounds = array<i64: 1, 8, 512>}, {transform_indices = @transform_1, window_bounds = array<i64: 32, 8>}, {transform_indices = @transform_2, window_bounds = array<i64: 1, 32, 128>}, {transform_indices = @transform_3, window_bounds = array<i64: 1, 1, 16, 128>}]} {
    %c0 = arith.constant 0 : index
    %c0_0 = arith.constant 0 : index
    %0 = vector.load %arg3[%c0, %c0_0] : memref<32x8xf32, #tpu.memory_space<vmem>>, vector<32x8xf32>
    %c0_1 = arith.constant 0 : index
    %c0_2 = arith.constant 0 : index
    %c0_3 = arith.constant 0 : index
    %1 = vector.load %arg4[%c0_1, %c0_2, %c0_3] : memref<1x32x128xi8, #tpu.memory_space<vmem>>, vector<1x32x128xi8>
    %2 = vector.shape_cast %1 : vector<1x32x128xi8> to vector<32x128xi8>
    %3 = arith.extui %2 : vector<32x128xi8> to vector<32x128xi32>
    %cst = arith.constant 0xFF800000 : f32
    %4 = vector.broadcast %cst : f32 to vector<32x128xf32>
    %c0_4 = arith.constant 0 : index
    %c0_5 = arith.constant 0 : index
    %c0_6 = arith.constant 0 : index
    %5 = vector.load %arg2[%c0_4, %c0_5, %c0_6] : memref<1x8x512xf32, #tpu.memory_space<vmem>>, vector<1x8x512xf32>
    %6 = vector.shape_cast %5 : vector<1x8x512xf32> to vector<8x512xf32>
    %cst_7 = arith.constant dense<0.000000e+00> : vector<32x512xf32>
    %7 = tpu.matmul %0, %6, %cst_7 {dimension_numbers = #tpu.dot_dimension_numbers<[1], [0], [0], [1], [0, 0, 1, 1], [], []>} : vector<32x8xf32>, vector<8x512xf32>, vector<32x512xf32> -> vector<32x512xf32>
    %8 = vector.extract_strided_slice %7 {offsets = [0, 0], sizes = [32, 128], strides = [1, 1]} : vector<32x512xf32> to vector<32x128xf32>
    %9 = arith.maximumf %4, %8 : vector<32x128xf32>
    %10 = vector.extract_strided_slice %7 {offsets = [0, 128], sizes = [32, 128], strides = [1, 1]} : vector<32x512xf32> to vector<32x128xf32>
    %11 = arith.maximumf %9, %10 : vector<32x128xf32>
    %12 = vector.extract_strided_slice %7 {offsets = [0, 256], sizes = [32, 128], strides = [1, 1]} : vector<32x512xf32> to vector<32x128xf32>
    %13 = arith.maximumf %11, %12 : vector<32x128xf32>
    %14 = vector.extract_strided_slice %7 {offsets = [0, 384], sizes = [32, 128], strides = [1, 1]} : vector<32x512xf32> to vector<32x128xf32>
    %15 = arith.maximumf %13, %14 : vector<32x128xf32>
    %cst_8 = arith.constant 0.000000e+00 : f32
    %16 = vector.broadcast %cst_8 : f32 to vector<32x128xf32>
    %cst_9 = arith.constant 0.000000e+00 : f32
    %17 = vector.broadcast %cst_9 : f32 to vector<32x128xf32>
    %c0_10 = arith.constant 0 : index
    %c0_11 = arith.constant 0 : index
    %c0_12 = arith.constant 0 : index
    %18 = vector.load %arg2[%c0_10, %c0_11, %c0_12] : memref<1x8x512xf32, #tpu.memory_space<vmem>>, vector<1x8x512xf32>
    %19 = vector.shape_cast %18 : vector<1x8x512xf32> to vector<8x512xf32>
    %cst_13 = arith.constant dense<0.000000e+00> : vector<32x512xf32>
    %20 = tpu.matmul %0, %19, %cst_13 {dimension_numbers = #tpu.dot_dimension_numbers<[1], [0], [0], [1], [0, 0, 1, 1], [], []>} : vector<32x8xf32>, vector<8x512xf32>, vector<32x512xf32> -> vector<32x512xf32>
    %21 = vector.extract_strided_slice %20 {offsets = [0, 0], sizes = [32, 128], strides = [1, 1]} : vector<32x512xf32> to vector<32x128xf32>
    %22 = arith.subf %21, %15 : vector<32x128xf32>
    %23 = math.exp %22 : vector<32x128xf32>
    %24 = arith.addf %16, %23 : vector<32x128xf32>
    %c0_i32 = arith.constant 0 : i32
    %25 = vector.broadcast %c0_i32 : i32 to vector<32x128xi32>
    %26 = arith.cmpi eq, %3, %25 : vector<32x128xi32>
    %cst_14 = arith.constant 0.000000e+00 : f32
    %27 = vector.broadcast %cst_14 : f32 to vector<32x128xf32>
    %28 = arith.select %26, %21, %27 : vector<32x128xi1>, vector<32x128xf32>
    %29 = arith.addf %17, %28 : vector<32x128xf32>
    %30 = vector.extract_strided_slice %20 {offsets = [0, 128], sizes = [32, 128], strides = [1, 1]} : vector<32x512xf32> to vector<32x128xf32>
    %31 = arith.subf %30, %15 : vector<32x128xf32>
    %32 = math.exp %31 : vector<32x128xf32>
    %33 = arith.addf %24, %32 : vector<32x128xf32>
    %c1_i32 = arith.constant 1 : i32
    %34 = vector.broadcast %c1_i32 : i32 to vector<32x128xi32>
    %35 = arith.cmpi eq, %3, %34 : vector<32x128xi32>
    %cst_15 = arith.constant 0.000000e+00 : f32
    %36 = vector.broadcast %cst_15 : f32 to vector<32x128xf32>
    %37 = arith.select %35, %30, %36 : vector<32x128xi1>, vector<32x128xf32>
    %38 = arith.addf %29, %37 : vector<32x128xf32>
    %39 = vector.extract_strided_slice %20 {offsets = [0, 256], sizes = [32, 128], strides = [1, 1]} : vector<32x512xf32> to vector<32x128xf32>
    %40 = arith.subf %39, %15 : vector<32x128xf32>
    %41 = math.exp %40 : vector<32x128xf32>
    %42 = arith.addf %33, %41 : vector<32x128xf32>
    %c2_i32 = arith.constant 2 : i32
    %43 = vector.broadcast %c2_i32 : i32 to vector<32x128xi32>
    %44 = arith.cmpi eq, %3, %43 : vector<32x128xi32>
    %cst_16 = arith.constant 0.000000e+00 : f32
    %45 = vector.broadcast %cst_16 : f32 to vector<32x128xf32>
    %46 = arith.select %44, %39, %45 : vector<32x128xi1>, vector<32x128xf32>
    %47 = arith.addf %38, %46 : vector<32x128xf32>
    %48 = vector.extract_strided_slice %20 {offsets = [0, 384], sizes = [32, 128], strides = [1, 1]} : vector<32x512xf32> to vector<32x128xf32>
    %49 = arith.subf %48, %15 : vector<32x128xf32>
    %50 = math.exp %49 : vector<32x128xf32>
    %51 = arith.addf %42, %50 : vector<32x128xf32>
    %c3_i32 = arith.constant 3 : i32
    %52 = vector.broadcast %c3_i32 : i32 to vector<32x128xi32>
    %53 = arith.cmpi eq, %3, %52 : vector<32x128xi32>
    %cst_17 = arith.constant 0.000000e+00 : f32
    %54 = vector.broadcast %cst_17 : f32 to vector<32x128xf32>
    %55 = arith.select %53, %48, %54 : vector<32x128xi1>, vector<32x128xf32>
    %56 = arith.addf %47, %55 : vector<32x128xf32>
    %57 = math.log %51 : vector<32x128xf32>
    %58 = arith.addf %15, %57 : vector<32x128xf32>
    %c255_i32 = arith.constant 255 : i32
    %59 = vector.broadcast %c255_i32 : i32 to vector<32x128xi32>
    %60 = arith.cmpi ne, %3, %59 : vector<32x128xi32>
    %61 = arith.subf %58, %56 : vector<32x128xf32>
    %cst_18 = arith.constant 0.000000e+00 : f32
    %62 = vector.broadcast %cst_18 : f32 to vector<32x128xf32>
    %63 = arith.select %60, %61, %62 : vector<32x128xi1>, vector<32x128xf32>
    %64 = vector.extract_strided_slice %63 {offsets = [0, 0], sizes = [8, 128], strides = [1, 1]} : vector<32x128xf32> to vector<8x128xf32>
    %65 = vector.extract_strided_slice %63 {offsets = [8, 0], sizes = [8, 128], strides = [1, 1]} : vector<32x128xf32> to vector<8x128xf32>
    %66 = arith.addf %64, %65 : vector<8x128xf32>
    %67 = vector.extract_strided_slice %63 {offsets = [16, 0], sizes = [8, 128], strides = [1, 1]} : vector<32x128xf32> to vector<8x128xf32>
    %68 = arith.addf %66, %67 : vector<8x128xf32>
    %69 = vector.extract_strided_slice %63 {offsets = [24, 0], sizes = [8, 128], strides = [1, 1]} : vector<32x128xf32> to vector<8x128xf32>
    %70 = arith.addf %68, %69 : vector<8x128xf32>
    %c0_19 = arith.constant 0 : index
    %c0_20 = arith.constant 0 : index
    %c0_21 = arith.constant 0 : index
    %c0_22 = arith.constant 0 : index
    %71 = vector.load %arg5[%c0_19, %c0_20, %c0_21, %c0_22] : memref<1x1x16x128xf32, #tpu.memory_space<vmem>>, vector<1x1x8x128xf32>
    %72 = vector.shape_cast %71 : vector<1x1x8x128xf32> to vector<8x128xf32>
    %73 = vector.shape_cast %70 : vector<8x128xf32> to vector<1x1x8x128xf32>
    tpu.vector_store %arg5[%c0_19, %c0_20, %c0_21, %c0_22], %73 {strides = array<i32>} : memref<1x1x16x128xf32, #tpu.memory_space<vmem>>, vector<1x1x8x128xf32>,
    %74 = arith.extui %60 : vector<32x128xi1> to vector<32x128xi32>
    %75 = arith.sitofp %74 : vector<32x128xi32> to vector<32x128xf32>
    %76 = vector.extract_strided_slice %75 {offsets = [0, 0], sizes = [8, 128], strides = [1, 1]} : vector<32x128xf32> to vector<8x128xf32>
    %77 = vector.extract_strided_slice %75 {offsets = [8, 0], sizes = [8, 128], strides = [1, 1]} : vector<32x128xf32> to vector<8x128xf32>
    %78 = arith.addf %76, %77 : vector<8x128xf32>
    %79 = vector.extract_strided_slice %75 {offsets = [16, 0], sizes = [8, 128], strides = [1, 1]} : vector<32x128xf32> to vector<8x128xf32>
    %80 = arith.addf %78, %79 : vector<8x128xf32>
    %81 = vector.extract_strided_slice %75 {offsets = [24, 0], sizes = [8, 128], strides = [1, 1]} : vector<32x128xf32> to vector<8x128xf32>
    %82 = arith.addf %80, %81 : vector<8x128xf32>
    %c0_23 = arith.constant 0 : index
    %c0_24 = arith.constant 0 : index
    %c8 = arith.constant 8 : index
    %c0_25 = arith.constant 0 : index
    %83 = vector.load %arg5[%c0_23, %c0_24, %c8, %c0_25] : memref<1x1x16x128xf32, #tpu.memory_space<vmem>>, vector<1x1x8x128xf32>
    %84 = vector.shape_cast %83 : vector<1x1x8x128xf32> to vector<8x128xf32>
    %85 = vector.shape_cast %82 : vector<8x128xf32> to vector<1x1x8x128xf32>
    tpu.vector_store %arg5[%c0_23, %c0_24, %c8, %c0_25], %85 {strides = array<i32>} : memref<1x1x16x128xf32, #tpu.memory_space<vmem>>, vector<1x1x8x128xf32>,
    return
  }
  func.func @transform_0(%arg0: i32, %arg1: i32) -> (i32, i32, i32) {
    %c0_i32 = arith.constant 0 : i32
    %c0_i32_0 = arith.constant 0 : i32
    %c0_i32_1 = arith.constant 0 : i32
    return %arg0, %c0_i32, %c0_i32_0 : i32, i32, i32
  }
  func.func @transform_1(%arg0: i32, %arg1: i32) -> (i32, i32) {
    %c0_i32 = arith.constant 0 : i32
    %c0_i32_0 = arith.constant 0 : i32
    return %arg1, %c0_i32 : i32, i32
  }
  func.func @transform_2(%arg0: i32, %arg1: i32) -> (i32, i32, i32) {
    %c0_i32 = arith.constant 0 : i32
    %c0_i32_0 = arith.constant 0 : i32
    return %arg0, %arg1, %c0_i32 : i32, i32, i32
  }
  func.func @transform_3(%arg0: i32, %arg1: i32) -> (i32, i32, i32, i32) {
    %c0_i32 = arith.constant 0 : i32
    %c0_i32_0 = arith.constant 0 : i32
    %c0_i32_1 = arith.constant 0 : i32
    return %arg0, %arg1, %c0_i32, %c0_i32_0 : i32, i32, i32, i32
  }
}

</mosaic_0001>

<bundles_post_ra>
// kernel: tpu_custom_call.1
= control target key start
LH: loop header
LB: loop body
LE: loop exit
PB: predicated region body
PF: predicated region fallthrough
CT: control target
= control target key end

     0   :  { %8 = vsyncpa [#allocation3], 0  ;;  %s1355_s0 = inlined_call_operand.hbm [shape: f32[2,8,512], index: 0, kind: input, shape index: {}]   ;;  %s1356_s1 = inlined_call_operand.vmem [shape: f32[32,8], index: 1, kind: input, shape index: {}]   ;;  %s1357_s2 = inlined_call_operand.vmem [shape: u8[2,32,128], index: 2, kind: input, shape index: {}]   ;;  %s1358_s3 = inlined_call_operand.hbm [shape: f32[2,1,16,128], index: 3, kind: output, shape index: {}]  }
   0x1   :  { %10 = vsyncpa [#allocation3 + $0x1], 0 }
   0x2   :  { %11 = vsyncpa [#allocation4], 0 }
   0x3   :  { %13 = vsyncpa [#allocation4 + $0x1], 0  ;;  %s1024_s12 = smov 0   ;;  %s1026_s13 = smov 0  }
   0x4   :  { %s1028_s14 = smov 0   ;;  %s1030_s15 = smov 0  }
   0x5   :  { %s1032_s16 = smov 0   ;;  %s1034_s17 = smov 0  }
   0x6 LB: > { %s753_s18 = sadd.s32 4294967295, %s997_s17   ;;  %s754_s19 = sadd.s32 4294967294, %s997_s17   ;;  %s997_s17 = sphi %s1034_s17, %s19_s17   ;;  %s993_s16 = sphi %s1032_s16, %s1370_s16   ;;  %s989_s15 = sphi %s1030_s15, %s1369_s15   ;;  %s985_s14 = sphi %s1028_s14, %s1368_s14   ;;  %s981_s13 = sphi %s1026_s13, %s1367_s13   ;;  %s977_s12 = sphi %s1024_s12, %s1366_s12  }
   0x7   : > { %s31_s20 = sadd.s32 1, %s993_s16  ;;  %s38_s21 = sadd.s32 1, %s985_s14 }
   0x8   : > { %p33_p0 = scmp.ge.s32.totalorder %s31_s20, 2  ;;  %p45_p1 = scmp.ne.s32.totalorder %s985_s14, %s981_s13 }
   0x9   : > { %p46_p2 = scmp.eq.s32.totalorder %s997_s17, 0  ;;  %p51_p3 = scmp.ne.s32.totalorder %s981_s13, %s977_s12 }
   0xa   : > { %s1372_s20 = smov (%p33_p0, %s31_s20), 0  ;;  %p52_p5 = scmp.eq.s32.totalorder %s753_s18, 0 }
   0xb   : > { %p1065_p4 = por %p46_p2, %p45_p1  ;;  %s35_s23 = ssub.s32 %s993_s16, %s1372_s20 }
   0xc   : > { %p131_p6 = scmp.eq.s32.totalorder %s753_s18, 1  ;;  %p36_p7 = scmp.eq.s32.totalorder %s35_s23, 0 }
   0xd   : > { %p1071_p8 = por %p52_p5, %p51_p3  ;;  %p137_p10 = scmp.eq.s32.totalorder %s754_s19, 1 }
   0xe   : > { %p1075_p9 = por %p131_p6, %p45_p1  ;;  %p796_p13 = scmp.lt.s32.totalorder %s997_s17, 2 }
   0xf   : > { %s1080_s26 = scalar_select %p36_p7, %s985_s14, %s38_s21  }
  0x10   : > { %p1082_p11 = por %p137_p10, %p51_p3  ;;  %s166_s28 = sand.u32 1, %s985_s14  }
  0x11   : > { %s758_s29 = sshll.u32 %s166_s28, 5  ;;  %s782_s30 = sshll.u32 %s993_s16, 9 }
  0x12   : > { %s1362_s27 = scalar_select %p1082_p11, 1, 0 }
  0x13   : > { %s176_s6 = scalar_lea.hbm %s1355_s0, %s782_s30  ;;  %s170_s7 = scalar_lea.vmem [#allocation2], %s758_s29 }
  0x14   : > { %s178_s8 = sshll.u32 %s170_s7, 4  ;;  %p1095_p0 = pnand %p796_p13, %p1065_p4  ;;  %s179_s8 = int_to_ptr.vmem [resolvable:$true] %s178_s8 }
  0x15   : > { %p761_p1 = scmp.ge.s32.totalorder %s997_s17, 1  ;;  %p193_p2 = scmp.lt.s32.totalorder %s997_s17, 3 }
  0x16   : > { %s167_s10 = scalar_lea.sflag [#allocation3], %s166_s28  ;;  %p891_p3 = pneg %p1095_p0 }
  0x17   : > { %s902_s11 = scalar_lea.vmem %s179_s8, 512  ;;  %s999_s18 = smov [#allocation2]  }
  0x18   : > { %p903_p5 = scmp.ne.s32.totalorder %s179_s8, %s902_s11  ;;  %s907_s19 = sshll.u32 %s999_s18, 4  ;;  %s908_s19 = int_to_ptr.vmem [resolvable:$false] %s907_s19 }
  0x19   : > { %s909_s21 = scalar_lea.vmem %s908_s19, 1024  ;;  %p910_p10 = scmp.lt.s32.totalorder %s179_s8, %s908_s19 }
  0x1a   : > { %p905_p6 = pnand %p903_p5, %p891_p3  ;;  %p911_p12 = scmp.lt.s32.totalorder %s909_s21, %s902_s11 }
  0x1c   : > { %p906_p7 = pneg %p905_p6  ;;  %p912_p4 = por %p911_p12, %p910_p10 }
  0x1e   : > { %p913_p13 = pnand %p912_p4, %p906_p7 }
  0x20   : > { %916 = shalt.err (!%p913_p13)
}
  0x21   : > { %791 = dma.hbm_to_vmem [thread:$0]  (!%p1095_p0), %s176_s6, 512, %s179_s8, %s167_s10  }
  0x22   : > { %p194_p11 = pnand %p761_p1, %p193_p2 }
  0x23   : > { %s1110_s22 = sand.u32 (!%p194_p11), 1, %s981_s13  }
  0x24   : > { %197 = sbr.rel (%p194_p11) target bundleno = 322 (0x142), region = 32  ;;  %s762_s23 = sshll.u32 (!%p194_p11), %s1110_s22, 5 }
  0x25   : > { %s200_s28 = scalar_lea.sflag (!%p194_p11), [#allocation3], %s1110_s22  ;;  %s203_s29 = scalar_lea.vmem (!%p194_p11), [#allocation2], %s762_s23 }
  0x29   : > { %968 = dma.done.wait (%p1071_p8), %s200_s28, 512  }
  0x2a   : > { %970 = vsyncadd (%p1071_p8), %s200_s28, 4294966784  ;;  %v1000_v0 = vmov 0.0   ;;  %v265_v1 = vld [vmem:[%s203_s29 + $0x8] sm:$0xff]  ;;  %v264_v2 = vld [vmem:[%s203_s29] sm:$0xff]  ;;  %vm268_vm0 = vcmask 64512   ;;  %p244_p8 = scmp.lt.s32.totalorder %s989_s15, 1 }
  0x2b   : > { %345 = vmatprep.mubr.f32.mxu0 %v1000_v0  ;;  %434 = vmatprep.mubr.f32.mxu1 %v1000_v0  ;;  %v251_v3 = vld [vmem:[%s1356_s1] sm:$0xff]  ;;  %v267_v4 = vld [vmem:[%s203_s29 + $0x18] sm:$0xff]  ;;  %v266_v5 = vld [vmem:[%s203_s29 + $0x10] sm:$0xff]  ;;  %s763_s23 = sshll.u32 %s1110_s22, 4  ;;  %s783_s29 = sshll.u32 %s989_s15, 8 }
  0x2c   : > { %311 = vmatprep.subr.mxu0 %v265_v1  ;;  %400 = vmatprep.subr.mxu1 %v267_v4  ;;  %v252_v6 = vld [vmem:[%s1356_s1 + $0x8] sm:$0xff]  ;;  %v253_v7 = vld [vmem:[%s1356_s1 + $0x10] sm:$0xff]  ;;  %v254_v8 = vld [vmem:[%s1356_s1 + $0x18] sm:$0xff]  ;;  %s245_s10 = scalar_select %p244_p8, %s989_s15, 1 }
  0x2d   : > { %312 = vmatpush1.msra.mxu0 %v264_v2  ;;  %401 = vmatpush1.msra.mxu1 %v266_v5  ;;  %s1164_s28 = scalar_lea.vmem [#allocation5], %s763_s23  ;;  %s1304_s5 = scalar_lea.hbm %s1358_s3, %s783_s29 }
  0x2e   : > { %765 = vmatmul.mubr.msk.f32.vlgmr.msra.gmra.mxu0 %vm268_vm0, %v251_v3  ;;  %769 = vmatmul.mubr.msk.f32.vlgmr.msra.gmra.mxu1 %vm268_vm0, %v251_v3  ;;  %s764_s11 = sshll.u32 %s245_s10, 3  ;;  %s639_s30 = sshll.u32 %s1164_s28, 4  ;;  %s1306_s30 = int_to_ptr.vmem [resolvable:$true] %s639_s30 }
  0x2f   : > { %351 = vmatprep.mubr.f32.mxu0 %v1000_v0  ;;  %440 = vmatprep.mubr.f32.mxu1 %v1000_v0  ;;  %s250_s21 = scalar_lea.vmem %s1357_s2, %s764_s11  ;;  %s624_s6 = scalar_lea.sflag [#allocation4], %s1110_s22 }
  0x30   : > { %v255_v9 = vld [vmem:[%s250_s21] sm:$0xff]  ;;  %s917_s7 = scalar_lea.vmem %s1306_s30, 256  ;;  %s1001_s15 = smov [#allocation5]  }
  0x31   : > { %v256_v10 = vunpack.c.0.s8 %v255_v9  ;;  %v257_v11 = vunpack.c.1.s8 %v255_v9  ;;  %v258_v14 = vunpack.c.2.s8 %v255_v9  ;;  %v259_v18 = vunpack.c.3.s8 %v255_v9  ;;  %p918_p11 = scmp.ne.s32.totalorder %s1306_s30, %s917_s7  ;;  %s921_s8 = sshll.u32 %s1001_s15, 4  ;;  %s922_s8 = int_to_ptr.vmem [resolvable:$false] %s921_s8 }
  0x32   : > { %766 = vmatmul.mubr.msk.f32.gmra.mxu0 %vm268_vm0, %v252_v6  ;;  %770 = vmatmul.mubr.msk.f32.gmra.mxu1 %vm268_vm0, %v252_v6  ;;  %s923_s9 = scalar_lea.vmem %s922_s8, 512  ;;  %p924_p1 = scmp.lt.s32.totalorder %s1306_s30, %s922_s8 }
  0x33   : > { %357 = vmatprep.mubr.f32.mxu0 %v1000_v0  ;;  %446 = vmatprep.mubr.f32.mxu1 %v1000_v0  ;;  %v1143_v12 = vand.u32 255, %v256_v10  ;;  %v1145_v13 = vand.u32 255, %v257_v11  ;;  %v1153_v17 = vand.u32 255, %v258_v14  ;;  %v1158_v21 = vand.u32 255, %v259_v18  ;;  %p919_p12 = pnand %p918_p11, %p1075_p9  ;;  %p925_p2 = scmp.lt.s32.totalorder %s923_s9, %s917_s7 }
  0x35   : > { %vm595_vm1 = vcmp.ne.s32.totalorder %v1143_v12, 255  ;;  %vm596_vm2 = vcmp.ne.s32.totalorder %v1145_v13, 255  ;;  %vm597_vm3 = vcmp.ne.s32.totalorder %v1153_v17, 255  ;;  %vm598_vm4 = vcmp.ne.s32.totalorder %v1158_v21, 255  ;;  %p920_p0 = pneg %p919_p12  ;;  %p926_p3 = por %p925_p2, %p924_p1 }
  0x36   : > { %767 = vmatmul.mubr.msk.f32.gmra.mxu0 %vm268_vm0, %v253_v7  ;;  %771 = vmatmul.mubr.msk.f32.gmra.mxu1 %vm268_vm0, %v253_v7  ;;  %v773_v15 = vsel %vm595_vm1, 1.0, %v1000_v0  ;;  %v774_v16 = vsel %vm596_vm2, 1.0, %v1000_v0  ;;  %v775_v20 = vsel %vm597_vm3, 1.0, %v1000_v0  ;;  %v776_v23 = vsel %vm598_vm4, 1.0, %v1000_v0 }
  0x37   : > { %363 = vmatprep.mubr.f32.mxu0 %v1000_v0  ;;  %452 = vmatprep.mubr.f32.mxu1 %v1000_v0  ;;  %v619_v19 = vadd.f32 %v774_v16, %v773_v15  ;;  %vm515_vm5 = vcmp.eq.s32.totalorder %v1143_v12, 1  ;;  %vm487_vm6 = vcmp.eq.s32.totalorder %v1143_v12, 0  ;;  %vm516_vm7 = vcmp.eq.s32.totalorder %v1145_v13, 1  ;;  %p927_p5 = pnand %p926_p3, %p920_p0 }
  0x38   : > { %vm543_vm8 = vcmp.eq.s32.totalorder %v1143_v12, 2  ;;  %vm488_vm9 = vcmp.eq.s32.totalorder %v1145_v13, 0  ;;  %vm517_vm10 = vcmp.eq.s32.totalorder %v1153_v17, 1  ;;  %vm544_vm11 = vcmp.eq.s32.totalorder %v1145_v13, 2 }
  0x39   : > { %v620_v22 = vadd.f32 %v775_v20, %v619_v19  ;;  %vm489_vm12 = vcmp.eq.s32.totalorder %v1153_v17, 0  ;;  %vm545_vm13 = vcmp.eq.s32.totalorder %v1153_v17, 2  ;;  %vm571_vm14 = vcmp.eq.s32.totalorder %v1143_v12, 3 }
  0x3a   : > { %768 = vmatmul.mubr.msk.f32.gmra.mxu0 %vm268_vm0, %v254_v8  ;;  %772 = vmatmul.mubr.msk.f32.gmra.mxu1 %vm268_vm0, %v254_v8  ;;  %vm572_vm15 = vcmp.eq.s32.totalorder %v1145_v13, 3  ;;  %vm518_vm0 = vcmp.eq.s32.totalorder %v1158_v21, 1 }
  0x3b   : > { %v621_v24 = vadd.f32 %v776_v23, %v620_v22 }
  0x3d   : > { %622 = vst [vmem:[%s1164_s28 + $0x8] sm:$0xff] %v621_v24 }
  0xee   : > { %v1167_v25 = vpop.f32.mrf.mxu0  ;;  %v1169_v26 = vpop.f32.mrf.mxu1 }
  0xf0   : > { %v1171_v27 = vpop.f32.mrf.mxu0  ;;  %v1175_v29 = vpop.f32.mrf.mxu1 }
  0xf1   : > { %v459_v28 = vmax.f32 %v1167_v25, %v1171_v27 }
  0xf2   : > { %v1177_v30 = vpop.f32.mrf.mxu0  ;;  %v1180_v32 = vpop.f32.mrf.mxu1 }
  0xf3   : > { %v463_v31 = vmax.f32 %v459_v28, %v1169_v26 }
  0xf4   : > { %v1182_v33 = vpop.f32.mrf.mxu0  ;;  %v1189_v36 = vpop.f32.mrf.mxu1 }
  0xf5   : > { %v1185_v34 = vmax.f32 %v463_v31, %v1175_v29  ;;  %v460_v35 = vmax.f32 %v1177_v30, %v1182_v33 }
  0xf6   : > { %v1191_v37 = vpop.f32.mrf.mxu0  ;;  %v1204_v44 = vpop.f32.mrf.mxu1 }
  0xf7   : > { %v471_v38 = vsub.f32 %v1167_v25, %v1185_v34  ;;  %v499_v39 = vsub.f32 %v1171_v27, %v1185_v34  ;;  %v527_v40 = vsub.f32 %v1169_v26, %v1185_v34  ;;  %v555_v41 = vsub.f32 %v1175_v29, %v1185_v34 }
  0xf8   : > { %v464_v42 = vmax.f32 %v460_v35, %v1180_v32  ;;  %v1202_v43 = vpop.f32.mrf.mxu0  ;;  %v1220_v56 = vpop.f32.mrf.mxu1 }
  0xf9   : > { %v475_v45 = vmul.f32 1.442695, %v471_v38  ;;  %v503_v46 = vmul.f32 1.442695, %v499_v39  ;;  %v531_v47 = vmul.f32 1.442695, %v527_v40  ;;  %v461_v48 = vmax.f32 %v1191_v37, %v1202_v43 }
  0xfa   : > { %v559_v49 = vmul.f32 1.442695, %v555_v41  ;;  %v1209_v50 = vmax.f32 %v464_v42, %v1189_v36  ;;  %v1211_v51 = vpop.f32.mrf.mxu0  ;;  %v1237_v4 = vpop.f32.mrf.mxu1 }
  0xfb   : > { %849 = vpow2.f32 %v475_v45  ;;  %v465_v52 = vmax.f32 %v461_v48, %v1204_v44 }
  0xfc   : > { %851 = vpow2.f32 %v503_v46  ;;  %v472_v53 = vsub.f32 %v1177_v30, %v1209_v50  ;;  %v500_v54 = vsub.f32 %v1182_v33, %v1209_v50  ;;  %v528_v55 = vsub.f32 %v1180_v32, %v1209_v50  ;;  %v1227_v59 = vpop.f32.mrf.mxu0  ;;  %v1242_v10 = vpop.f32.mrf.mxu1 }
  0xfd   : > { %853 = vpow2.f32 %v531_v47  ;;  %v556_v57 = vsub.f32 %v1189_v36, %v1209_v50  ;;  %v1225_v58 = vmax.f32 %v465_v52, %v1220_v56  ;;  %v462_v3 = vmax.f32 %v1211_v51, %v1227_v59 }
  0xfe   : > { %855 = vpow2.f32 %v559_v49  ;;  %v477_v60 = vmul.f32 1.442695, %v472_v53  ;;  %v505_v61 = vmul.f32 1.442695, %v500_v54  ;;  %v533_v62 = vmul.f32 1.442695, %v528_v55 }
  0xff   : > { %v561_v63 = vmul.f32 1.442695, %v556_v57  ;;  %v473_v0 = vsub.f32 %v1191_v37, %v1225_v58  ;;  %v501_v1 = vsub.f32 %v1202_v43, %v1225_v58  ;;  %v529_v2 = vsub.f32 %v1204_v44, %v1225_v58 }
 0x100   : > { %857 = vpow2.f32 %v477_v60  ;;  %v557_v7 = vsub.f32 %v1220_v56, %v1225_v58  ;;  %v466_v9 = vmax.f32 %v462_v3, %v1237_v4  ;;  %v520_v3 = vsel %vm516_vm7, %v1182_v33, 0.0 }
 0x101   : > { %859 = vpow2.f32 %v505_v61  ;;  %v479_v5 = vmul.f32 1.442695, %v473_v0  ;;  %v507_v6 = vmul.f32 1.442695, %v501_v1  ;;  %v535_v8 = vmul.f32 1.442695, %v529_v2 }
 0x102   : > { %861 = vpow2.f32 %v533_v62  ;;  %v563_v11 = vmul.f32 1.442695, %v557_v7  ;;  %v1245_v14 = vmax.f32 %v466_v9, %v1242_v10  ;;  %v519_v0 = vsel %vm515_vm5, %v1171_v27, 0.0 }
 0x103   : > { %863 = vpow2.f32 %v561_v63  ;;  %v491_v2 = vsel %vm487_vm6, %v1167_v25, 0.0  ;;  %v547_v27 = vsel %vm543_vm8, %v1169_v26, 0.0  ;;  %v492_v9 = vsel %vm488_vm9, %v1177_v30, 0.0 }
 0x104   : > { %865 = vpow2.f32 %v479_v5  ;;  %v474_v15 = vsub.f32 %v1211_v51, %v1245_v14  ;;  %v502_v16 = vsub.f32 %v1227_v59, %v1245_v14  ;;  %v530_v18 = vsub.f32 %v1237_v4, %v1245_v14 }
 0x105   : > { %867 = vpow2.f32 %v507_v6  ;;  %v558_v20 = vsub.f32 %v1242_v10, %v1245_v14  ;;  %v523_v7 = vadd.f32 %v519_v0, %v491_v2  ;;  %v521_v25 = vsel %vm517_vm10, %v1202_v43, 0.0 }
 0x106   : > { %869 = vpow2.f32 %v535_v8  ;;  %v481_v23 = vmul.f32 1.442695, %v474_v15  ;;  %v509_v24 = vmul.f32 1.442695, %v502_v16  ;;  %v537_v35 = vmul.f32 1.442695, %v530_v18 }
 0x107   : > { %871 = vpow2.f32 %v563_v11  ;;  %v565_v39 = vmul.f32 1.442695, %v558_v20  ;;  %v524_v16 = vadd.f32 %v520_v3, %v492_v9  ;;  %v548_v18 = vsel %vm544_vm11, %v1180_v32, 0.0 }
 0x108   : > { %v850_v19 = vpop.eup %849  ;;  %873 = vpow2.f32 %v481_v23  ;;  %v551_v20 = vadd.f32 %v547_v27, %v523_v7  ;;  %v493_v26 = vsel %vm489_vm12, %v1191_v37, 0.0  ;;  %v549_v43 = vsel %vm545_vm13, %v1204_v44, 0.0 }
 0x109   : > { %v852_v22 = vpop.eup %851  ;;  %875 = vpow2.f32 %v509_v24  ;;  %v552_v23 = vadd.f32 %v548_v18, %v524_v16  ;;  %v575_v32 = vsel %vm571_vm14, %v1175_v29, 0.0  ;;  %vm490_vm5 = vcmp.eq.s32.totalorder %v1158_v21, 0 }
 0x10a   : > { %v854_v28 = vpop.eup %853  ;;  %v511_v31 = vadd.f32 %v852_v22, %v850_v19  ;;  %877 = vpow2.f32 %v537_v35  ;;  %v525_v22 = vadd.f32 %v521_v25, %v493_v26  ;;  %v576_v35 = vsel %vm572_vm15, %v1189_v36, 0.0 }
 0x10b   : > { %v856_v38 = vpop.eup %855  ;;  %879 = vpow2.f32 %v565_v39  ;;  %vm573_vm6 = vcmp.eq.s32.totalorder %v1153_v17, 3  ;;  %v580_v37 = vadd.f32 %v576_v35, %v552_v23  ;;  %v522_v44 = vsel %vm518_vm0, %v1227_v59, 0.0 }
 0x10c   : > { %v539_v40 = vadd.f32 %v854_v28, %v511_v31  ;;  %v579_v28 = vadd.f32 %v575_v32, %v551_v20  ;;  %vm546_vm7 = vcmp.eq.s32.totalorder %v1158_v21, 2  ;;  %vm574_vm8 = vcmp.eq.s32.totalorder %v1158_v21, 3 }
 0x10d   : > { %v858_v41 = vpop.eup %857 }
 0x10e   : > { %v860_v42 = vpop.eup %859  ;;  %v567_v45 = vadd.f32 %v856_v38, %v539_v40  ;;  %v553_v38 = vadd.f32 %v549_v43, %v525_v22 }
 0x10f   : > { %v862_v46 = vpop.eup %861  ;;  %v512_v47 = vadd.f32 %v860_v42, %v858_v41  ;;  %v494_v41 = vsel %vm490_vm5, %v1211_v51, 0.0  ;;  %v577_v42 = vsel %vm573_vm6, %v1220_v56, 0.0 }
 0x110   : > { %v864_v48 = vpop.eup %863  ;;  %881 = vlog2.f32 %v567_v45  ;;  %v581_v45 = vadd.f32 %v577_v42, %v553_v38 }
 0x111   : > { %v866_v49 = vpop.eup %865  ;;  %v540_v52 = vadd.f32 %v862_v46, %v512_v47  ;;  %v526_v46 = vadd.f32 %v522_v44, %v494_v41 }
 0x112   : > { %v868_v53 = vpop.eup %867 }
 0x113   : > { %v568_v54 = vadd.f32 %v864_v48, %v540_v52  ;;  %v513_v55 = vadd.f32 %v868_v53, %v866_v49  ;;  %v870_v57 = vpop.eup %869  ;;  %v550_v48 = vsel %vm546_vm7, %v1237_v4, 0.0 }
 0x114   : > { %v872_v61 = vpop.eup %871  ;;  %v554_v51 = vadd.f32 %v550_v48, %v526_v46 }
 0x115   : > { %883 = vlog2.f32 %v568_v54  ;;  %v541_v60 = vadd.f32 %v870_v57, %v513_v55  ;;  %v874_v63 = vpop.eup %873  ;;  %v578_v54 = vsel %vm574_vm8, %v1242_v10, 0.0 }
 0x116   : > { %v876_v1 = vpop.eup %875  ;;  %v582_v55 = vadd.f32 %v578_v54, %v554_v51 }
 0x117   : > { %v569_v62 = vadd.f32 %v872_v61, %v541_v60  ;;  %v514_v5 = vadd.f32 %v876_v1, %v874_v63  ;;  %v878_v6 = vpop.eup %877 }
 0x118   : > { %v880_v8 = vpop.eup %879 }
 0x119   : > { %885 = vlog2.f32 %v569_v62  ;;  %v542_v11 = vadd.f32 %v878_v6, %v514_v5 }
 0x11b   : > { %v570_v19 = vadd.f32 %v880_v8, %v542_v11 }
 0x11d   : > { %v882_v15 = vpop.eup %881  ;;  %887 = vlog2.f32 %v570_v19 }
 0x11e   : > { %v584_v33 = vmul.f32 0.6931472, %v882_v15 }
 0x120   : > { %v591_v30 = vadd.f32 %v584_v33, %v1185_v34 }
 0x122   : > { %v884_v24 = vpop.eup %883  ;;  %v599_v34 = vsub.f32 %v591_v30, %v579_v28 }
 0x123   : > { %v586_v31 = vmul.f32 0.6931472, %v884_v24 }
 0x124   : > { %v603_v47 = vsel %vm595_vm1, %v599_v34, 0.0 }
 0x125   : > { %v592_v39 = vadd.f32 %v586_v31, %v1209_v50 }
 0x126   : > { %v886_v40 = vpop.eup %885 }
 0x127   : > { %v600_v29 = vsub.f32 %v592_v39, %v580_v37  ;;  %v588_v36 = vmul.f32 0.6931472, %v886_v40 }
 0x129   : > { %v604_v50 = vsel %vm596_vm2, %v600_v29, 0.0  ;;  %v593_v59 = vadd.f32 %v588_v36, %v1225_v58 }
 0x12a   : > { %v607_v49 = vadd.f32 %v604_v50, %v603_v47  ;;  %v888_v56 = vpop.eup %887 }
 0x12b   : > { %v601_v52 = vsub.f32 %v593_v59, %v581_v45  ;;  %v590_v13 = vmul.f32 0.6931472, %v888_v56 }
 0x12d   : > { %v605_v12 = vsel %vm597_vm3, %v601_v52, 0.0  ;;  %v594_v58 = vadd.f32 %v590_v13, %v1245_v14 }
 0x12e   : > { %v608_v53 = vadd.f32 %v607_v49, %v605_v12 }
 0x12f   : > { %v602_v4 = vsub.f32 %v594_v58, %v582_v55 }
 0x131   : > { %v606_v57 = vsel %vm598_vm4, %v602_v4, 0.0 }
 0x132   : > { %v609_v17 = vadd.f32 %v608_v53, %v606_v57 }
 0x134   : > { %610 = vst [vmem:[%s1164_s28] sm:$0xff] %v609_v17 }
 0x135   : > { %930 = shalt.err (!%p927_p5)
}
 0x136   : > { %s931_s10 = scalar_lea.hbm %s1304_s5, 256  ;;  %s935_s19 = scalar_lea.hbm %s1358_s3, 512 }
 0x137   : > { %p932_p6 = scmp.ne.s32.totalorder %s1304_s5, %s931_s10  ;;  %p936_p4 = scmp.lt.s32.totalorder %s1304_s5, %s1358_s3 }
 0x138   : > { %p937_p13 = scmp.lt.s32.totalorder %s935_s19, %s931_s10 }
 0x139   : > { %p933_p7 = pnand %p932_p6, %p1075_p9 }
 0x13a   : > { %p938_p8 = por %p937_p13, %p936_p4 }
 0x13b   : > { %p934_p10 = pneg %p933_p7 }
 0x13d   : > { %p939_p11 = pnand %p938_p8, %p934_p10 }
 0x13f   : > { %942 = shalt.err (!%p939_p11)
}
 0x140   : > { %s1002_s28 = smov 128   ;;  %s1003_s29 = smov 8  }
 0x141   : > { %786 = dma.vmem_to_hbm [thread:$0]  (%p1075_p9), %s1306_s30, 256, %s1304_s5, %s624_s6, %s1002_s28, %s1002_s28, %s1003_s29  }
 0x142 PF: > { %s654_s4 = sand.u32 1, %s977_s12   ;;  %p1364_p12 = scmp.ne.s32.totalorder %s1362_s27, 0 }
 0x143   : > { %p1365_p0 = scmp.ge.s32.totalorder %s997_s17, 2  ;;  %s655_s24 = scalar_lea.sflag [#allocation4], %s654_s4 }
 0x145   : > { %p793_p1 = pnand %p1365_p0, %p1364_p12 }
 0x147   : > { %p794_p2 = pneg %p793_p1 }
 0x149   : > { %972 = dma.done.wait (%p794_p2), %s655_s24, 256  }
 0x14a   : > { %974 = vsyncadd (%p794_p2), %s655_s24, 4294967040  ;;  %s19_s17 = sadd.s32 1, %s997_s17   ;;  %s1366_s12 = smov %s981_s13 }
 0x14b   : > { %p16_p3 = scmp.ge.s32.totalorder %s19_s17, 4   ;;  %s1367_s13 = smov %s985_s14 }
 0x14c   : > { %s1368_s14 = smov %s1080_s26  ;;  %s1369_s15 = smov %s993_s16 }
 0x14d   : > { %s1370_s16 = smov %s1372_s20  ;;  %18 = sbr.rel (!%p16_p3) target bundleno = 6 (0x6), region = 83 }
 0x152   :  { %660 = vsyncpa [#allocation3], 1 }
 0x153   :  { %662 = vsyncpa [#allocation3 + $0x1], 1 }
 0x154   :  { %663 = vsyncpa [#allocation4], 1 }
 0x155   :  { %665 = vsyncpa [#allocation4 + $0x1], 1 }

</bundles_post_ra>
